<compile_context>
chip_gen: v6e
topology: v6e:2x2x1
jax: 0.10.0
libtpu: 0.0.40
codegen_flags: <defaults>
</compile_context>

<pallas_src>
import functools

import jax
import jax.numpy as jnp
from jax import lax
from jax.experimental import pallas as pl
from jax.experimental.pallas import tpu as pltpu


def _round_up(x, m):
    return ((x + m - 1) // m) * m


def _conv3x3_relu_kernel(x_ref, w_ref, b_ref, col_ref, o_ref, xpad_ref,
                         *, H, W, Cin, pad_l):
    # x_ref:    (1, Cin, H*W)              one image, NCHW flattened: H*W on lanes
    # w_ref:    (Cout, 9*CIN_PAD) bf16     tap-major, channel-padded weights
    # b_ref:    (Cout, 1) f32              bias
    # col_ref:  (1, H*W) int32             column index j = p % W per flat position
    # o_ref:    (1, Cout, H*W)             dense stride-1 output, channels-first
    # xpad_ref: (CIN_PAD, pad_l+H*W+pad_r) bf16 scratch: flattened image + zero halo
    HW = H * W
    Cout = o_ref.shape[1]

    # Zero the scratch ONCE (first grid step).  Halo columns and the padded
    # channel rows never change afterwards; the interior (real channels) is
    # fully overwritten below every step.  Safe because the single grid axis is
    # "arbitrary" (sequential on one core) and scratch persists across steps.
    @pl.when(pl.program_id(0) == 0)
    def _():
        xpad_ref[...] = jnp.zeros(xpad_ref.shape, xpad_ref.dtype)

    # Lane-aligned interior copy (pad_l is a multiple of 128); f32->bf16 cast is
    # fused into this single store of the real channels.
    xpad_ref[:Cin, pad_l:pad_l + HW] = x_ref[0].astype(jnp.bfloat16)

    # Column-edge masks (hoisted): left/right taps must not read across a row
    # boundary of the flattened layout.
    col = col_ref[...]                        # (1, HW) int32
    keep_left = col > 0                       # valid lanes when kw == 0 (reads j-1)
    keep_right = col < (W - 1)                # valid lanes when kw == 2 (reads j+1)

    # im2col: 9 lane-shifted slices of the padded image, stacked on sublanes.
    # Each piece is (CIN_PAD, HW) bf16 == whole bf16 sublane tiles, so the
    # concatenation along sublanes is tile-aligned.
    pieces = []
    for kh in range(3):
        for kw in range(3):
            start = pad_l + (kh - 1) * W + (kw - 1)     # static, always >= 0
            piece = xpad_ref[:, start:start + HW]       # (CIN_PAD, HW) bf16
            if kw == 0:
                piece = jnp.where(keep_left, piece, jnp.zeros_like(piece))
            elif kw == 2:
                piece = jnp.where(keep_right, piece, jnp.zeros_like(piece))
            pieces.append(piece)
    im2col = jnp.concatenate(pieces, axis=0)            # (9*CIN_PAD, HW) bf16

    # Single fused MXU matmul, K = 9*CIN_PAD, f32 accumulation.
    acc = jnp.dot(w_ref[...], im2col, preferred_element_type=jnp.float32)
    acc = acc + b_ref[...]                              # (Cout, 1) f32 broadcast
    acc = jnp.maximum(acc, 0.0)
    o_ref[0] = acc.astype(o_ref.dtype)                  # lane-dense store


def block_q_forward(x_nchw, w_oihw, b, *, stride=1):
    """Conv2d(k=3, stride, pad=1) + ReLU, matching the PyTorch BlockQ forward."""
    N, Cin, H, W = x_nchw.shape
    Cout = w_oihw.shape[0]
    HW = H * W

    cin_pad = _round_up(Cin, 16)          # bf16 sublane tile -> aligned im2col concat
    pad_l = _round_up(W + 1, 128)         # left halo, 128-lane aligned interior copy
    pad_r = _round_up(W + 1, 128)         # right halo
    wtot = pad_l + HW + pad_r

    # Glue (cheap / free), all outside the kernel:
    x_flat = x_nchw.reshape(N, Cin, HW)                         # free reshape (stays NCHW)
    wt = jnp.transpose(w_oihw, (0, 2, 3, 1))                    # (Cout, 3, 3, Cin)
    wt = jnp.pad(wt, ((0, 0), (0, 0), (0, 0), (0, cin_pad - Cin)))
    w2d = wt.reshape(Cout, 9 * cin_pad).astype(jnp.bfloat16)    # cast once, resident block
    b2d = b.reshape(Cout, 1).astype(jnp.float32)
    col_ids = jnp.tile(jnp.arange(W, dtype=jnp.int32), H).reshape(1, HW)   # j = p % W

    kernel = functools.partial(_conv3x3_relu_kernel, H=H, W=W, Cin=Cin, pad_l=pad_l)

    itemsize = jnp.dtype(x_nchw.dtype).itemsize
    flops = 2 * N * HW * 9 * Cin * Cout
    bytes_accessed = (N * Cin * HW * itemsize        # input
                      + Cout * 9 * cin_pad * 2       # bf16 weights
                      + Cout * 4                     # bias
                      + HW * 4                       # column ids
                      + N * Cout * HW * itemsize)    # output

    out_flat = pl.pallas_call(
        kernel,
        out_shape=jax.ShapeDtypeStruct((N, Cout, HW), x_nchw.dtype),
        grid_spec=pltpu.PrefetchScalarGridSpec(
            num_scalar_prefetch=0,
            grid=(N,),
            in_specs=[
                pl.BlockSpec((1, Cin, HW), lambda n: (n, 0, 0)),
                pl.BlockSpec((Cout, 9 * cin_pad), lambda n: (0, 0)),
                pl.BlockSpec((Cout, 1), lambda n: (0, 0)),
                pl.BlockSpec((1, HW), lambda n: (0, 0)),
            ],
            out_specs=pl.BlockSpec((1, Cout, HW), lambda n: (n, 0, 0)),
            scratch_shapes=[
                pltpu.VMEM((cin_pad, wtot), jnp.bfloat16),
            ],
        ),
        compiler_params=pltpu.CompilerParams(
            # "arbitrary": the grid must run sequentially on one core so the
            # zero-once scratch init at program_id==0 is valid for every step.
            dimension_semantics=("arbitrary",),
            vmem_limit_bytes=32 * 1024 * 1024,
        ),
        cost_estimate=pl.CostEstimate(
            flops=flops, transcendentals=0, bytes_accessed=bytes_accessed),
    )(x_flat, w2d, b2d, col_ids)

    out = out_flat.reshape(N, Cout, H, W)
    if stride != 1:
        # Dense stride-1 conv subsampled on a stride grid == strided conv for
        # k=3, pad=1 (Ho = (H-1)//s + 1). ReLU/bias commute with the slice.
        # TODO(synk): move this subsampling into the kernel store for stride>1.
        out = out[:, :, ::stride, ::stride]
    return out


def _reference(x_nchw, w_oihw, b, *, stride=1):
    out = lax.conv_general_dilated(
        x_nchw, w_oihw,
        window_strides=(stride, stride),
        padding=((1, 1), (1, 1)),
        dimension_numbers=("NCHW", "OIHW", "NCHW"),
    )
    out = out + b.reshape(1, -1, 1, 1)
    return jnp.maximum(out, 0.0)


if __name__ == "__main__":
    key = jax.random.PRNGKey(0)
    k_x, k_w, k_b = jax.random.split(key, 3)

    # BlockQ(in_size=4, out_size=8), default std=1
    N, Cin, H, W = 2, 4, 16, 16
    Cout = 8

    x = jax.random.normal(k_x, (N, Cin, H, W), dtype=jnp.float32)
    # PyTorch Conv2d weight shape: OIHW
    w = jax.random.normal(k_w, (Cout, Cin, 3, 3), dtype=jnp.float32) * 0.1
    b = jax.random.normal(k_b, (Cout,), dtype=jnp.float32) * 0.1

    out = jax.block_until_ready(block_q_forward(x, w, b, stride=1))
    ref = jax.block_until_ready(_reference(x, w, b, stride=1))
    assert out.shape == (N, Cout, H, W), out.shape
    # bf16 MXU operands (f32 accumulation) -> slightly looser tolerance vs f32 ref.
    assert jnp.allclose(out, ref, atol=2e-2, rtol=2e-2), "mismatch vs reference (stride=1)"

    # Also exercise BlockQ's std != 1 path.
    out2 = jax.block_until_ready(block_q_forward(x, w, b, stride=2))
    ref2 = jax.block_until_ready(_reference(x, w, b, stride=2))
    assert out2.shape == ref2.shape, (out2.shape, ref2.shape)
    assert jnp.allclose(out2, ref2, atol=2e-2, rtol=2e-2), "mismatch vs reference (stride=2)"

    print("KERNEL_OK")
</pallas_src>

<mosaic_0001>
module attributes {stable_mosaic.version = 11 : i64} {
  func.func @_conv3x3_relu_kernel(%arg0: i32, %arg1: memref<1x4x256xf32, #tpu.memory_space<vmem>>, %arg2: memref<8x144xbf16, #tpu.memory_space<vmem>>, %arg3: memref<8x1xf32, #tpu.memory_space<vmem>>, %arg4: memref<1x256xi32, #tpu.memory_space<vmem>>, %arg5: memref<1x8x256xf32, #tpu.memory_space<vmem>>, %arg6: memref<16x512xbf16, #tpu.memory_space<vmem>>) attributes {dimension_semantics = [#tpu.dimension_semantics<arbitrary>], iteration_bounds = array<i64: 2>, scalar_prefetch = 0 : i64, scratch_operands = 1 : i64, tpu.core_type = #tpu.core_type<tc>, window_params = [{transform_indices = @transform_0, window_bounds = array<i64: 1, 4, 256>}, {pipeline_mode = #tpu.pipeline_mode<synchronous>, transform_indices = @transform_1, window_bounds = array<i64: 8, 144>}, {pipeline_mode = #tpu.pipeline_mode<synchronous>, transform_indices = @transform_2, window_bounds = array<i64: 8, 1>}, {pipeline_mode = #tpu.pipeline_mode<synchronous>, transform_indices = @transform_3, window_bounds = array<i64: 1, 256>}, {transform_indices = @transform_4, window_bounds = array<i64: 1, 8, 256>}]} {
    %c0_i32 = arith.constant 0 : i32
    %0 = arith.cmpi eq, %arg0, %c0_i32 : i32
    %1 = arith.extui %0 : i1 to i32
    %c0_i32_0 = arith.constant 0 : i32
    %2 = arith.cmpi ne, %1, %c0_i32_0 : i32
    scf.if %2 {
      %cst_31 = arith.constant 0.000000e+00 : bf16
      %56 = vector.broadcast %cst_31 : bf16 to vector<16x512xbf16>
      %c0_32 = arith.constant 0 : index
      %c0_33 = arith.constant 0 : index
      %57 = vector.load %arg6[%c0_32, %c0_33] : memref<16x512xbf16, #tpu.memory_space<vmem>>, vector<16x512xbf16>
      tpu.vector_store %arg6[%c0_32, %c0_33], %56 {strides = array<i32>} : memref<16x512xbf16, #tpu.memory_space<vmem>>, vector<16x512xbf16>,
    } else {
    }
    %c0 = arith.constant 0 : index
    %c0_1 = arith.constant 0 : index
    %c0_2 = arith.constant 0 : index
    %3 = vector.load %arg1[%c0, %c0_1, %c0_2] : memref<1x4x256xf32, #tpu.memory_space<vmem>>, vector<1x4x256xf32>
    %4 = vector.shape_cast %3 : vector<1x4x256xf32> to vector<4x256xf32>
    %5 = arith.truncf %4 : vector<4x256xf32> to vector<4x256xbf16>
    %c0_3 = arith.constant 0 : index
    %c128 = arith.constant 128 : index
    %6 = vector.load %arg6[%c0_3, %c128] : memref<16x512xbf16, #tpu.memory_space<vmem>>, vector<4x256xbf16>
    tpu.vector_store %arg6[%c0_3, %c128], %5 {strides = array<i32>} : memref<16x512xbf16, #tpu.memory_space<vmem>>, vector<4x256xbf16>,
    %c0_4 = arith.constant 0 : index
    %c0_5 = arith.constant 0 : index
    %7 = vector.load %arg4[%c0_4, %c0_5] : memref<1x256xi32, #tpu.memory_space<vmem>>, vector<1x256xi32>
    %c0_i32_6 = arith.constant 0 : i32
    %8 = vector.broadcast %c0_i32_6 : i32 to vector<1x256xi32>
    %9 = arith.cmpi sgt, %7, %8 : vector<1x256xi32>
    %c15_i32 = arith.constant 15 : i32
    %10 = vector.broadcast %c15_i32 : i32 to vector<1x256xi32>
    %11 = arith.cmpi slt, %7, %10 : vector<1x256xi32>
    %c0_7 = arith.constant 0 : index
    %c111 = arith.constant 111 : index
    %12 = vector.load %arg6[%c0_7, %c111] : memref<16x512xbf16, #tpu.memory_space<vmem>>, vector<16x256xbf16>
    %cst = arith.constant 0.000000e+00 : bf16
    %13 = vector.broadcast %cst : bf16 to vector<16x256xbf16>
    %14 = vector.shape_cast %9 : vector<1x256xi1> to vector<1x256xi1>
    %15 = vector.broadcast %14 : vector<1x256xi1> to vector<16x256xi1>
    %16 = arith.select %15, %12, %13 : vector<16x256xi1>, vector<16x256xbf16>
    %c0_8 = arith.constant 0 : index
    %c112 = arith.constant 112 : index
    %17 = vector.load %arg6[%c0_8, %c112] : memref<16x512xbf16, #tpu.memory_space<vmem>>, vector<16x256xbf16>
    %c0_9 = arith.constant 0 : index
    %c113 = arith.constant 113 : index
    %18 = vector.load %arg6[%c0_9, %c113] : memref<16x512xbf16, #tpu.memory_space<vmem>>, vector<16x256xbf16>
    %cst_10 = arith.constant 0.000000e+00 : bf16
    %19 = vector.broadcast %cst_10 : bf16 to vector<16x256xbf16>
    %20 = vector.shape_cast %11 : vector<1x256xi1> to vector<1x256xi1>
    %21 = vector.broadcast %20 : vector<1x256xi1> to vector<16x256xi1>
    %22 = arith.select %21, %18, %19 : vector<16x256xi1>, vector<16x256xbf16>
    %c0_11 = arith.constant 0 : index
    %c127 = arith.constant 127 : index
    %23 = vector.load %arg6[%c0_11, %c127] : memref<16x512xbf16, #tpu.memory_space<vmem>>, vector<16x256xbf16>
    %cst_12 = arith.constant 0.000000e+00 : bf16
    %24 = vector.broadcast %cst_12 : bf16 to vector<16x256xbf16>
    %25 = vector.shape_cast %9 : vector<1x256xi1> to vector<1x256xi1>
    %26 = vector.broadcast %25 : vector<1x256xi1> to vector<16x256xi1>
    %27 = arith.select %26, %23, %24 : vector<16x256xi1>, vector<16x256xbf16>
    %c0_13 = arith.constant 0 : index
    %c128_14 = arith.constant 128 : index
    %28 = vector.load %arg6[%c0_13, %c128_14] : memref<16x512xbf16, #tpu.memory_space<vmem>>, vector<16x256xbf16>
    %c0_15 = arith.constant 0 : index
    %c129 = arith.constant 129 : index
    %29 = vector.load %arg6[%c0_15, %c129] : memref<16x512xbf16, #tpu.memory_space<vmem>>, vector<16x256xbf16>
    %cst_16 = arith.constant 0.000000e+00 : bf16
    %30 = vector.broadcast %cst_16 : bf16 to vector<16x256xbf16>
    %31 = vector.shape_cast %11 : vector<1x256xi1> to vector<1x256xi1>
    %32 = vector.broadcast %31 : vector<1x256xi1> to vector<16x256xi1>
    %33 = arith.select %32, %29, %30 : vector<16x256xi1>, vector<16x256xbf16>
    %c0_17 = arith.constant 0 : index
    %c143 = arith.constant 143 : index
    %34 = vector.load %arg6[%c0_17, %c143] : memref<16x512xbf16, #tpu.memory_space<vmem>>, vector<16x256xbf16>
    %cst_18 = arith.constant 0.000000e+00 : bf16
    %35 = vector.broadcast %cst_18 : bf16 to vector<16x256xbf16>
    %36 = vector.shape_cast %9 : vector<1x256xi1> to vector<1x256xi1>
    %37 = vector.broadcast %36 : vector<1x256xi1> to vector<16x256xi1>
    %38 = arith.select %37, %34, %35 : vector<16x256xi1>, vector<16x256xbf16>
    %c0_19 = arith.constant 0 : index
    %c144 = arith.constant 144 : index
    %39 = vector.load %arg6[%c0_19, %c144] : memref<16x512xbf16, #tpu.memory_space<vmem>>, vector<16x256xbf16>
    %c0_20 = arith.constant 0 : index
    %c145 = arith.constant 145 : index
    %40 = vector.load %arg6[%c0_20, %c145] : memref<16x512xbf16, #tpu.memory_space<vmem>>, vector<16x256xbf16>
    %cst_21 = arith.constant 0.000000e+00 : bf16
    %41 = vector.broadcast %cst_21 : bf16 to vector<16x256xbf16>
    %42 = vector.shape_cast %11 : vector<1x256xi1> to vector<1x256xi1>
    %43 = vector.broadcast %42 : vector<1x256xi1> to vector<16x256xi1>
    %44 = arith.select %43, %40, %41 : vector<16x256xi1>, vector<16x256xbf16>
    %45 = tpu.concatenate %16, %17, %22, %27, %28, %33, %38, %39, %44 in 0 : vector<16x256xbf16>, vector<16x256xbf16>, vector<16x256xbf16>, vector<16x256xbf16>, vector<16x256xbf16>, vector<16x256xbf16>, vector<16x256xbf16>, vector<16x256xbf16>, vector<16x256xbf16> -> vector<144x256xbf16>
    %c0_22 = arith.constant 0 : index
    %c0_23 = arith.constant 0 : index
    %46 = vector.load %arg2[%c0_22, %c0_23] : memref<8x144xbf16, #tpu.memory_space<vmem>>, vector<8x144xbf16>
    %cst_24 = arith.constant dense<0.000000e+00> : vector<8x256xf32>
    %47 = tpu.matmul %46, %45, %cst_24 {dimension_numbers = #tpu.dot_dimension_numbers<[1], [0], [0], [1], [0, 0, 1, 1], [], []>} : vector<8x144xbf16>, vector<144x256xbf16>, vector<8x256xf32> -> vector<8x256xf32>
    %c0_25 = arith.constant 0 : index
    %c0_26 = arith.constant 0 : index
    %48 = vector.load %arg3[%c0_25, %c0_26] : memref<8x1xf32, #tpu.memory_space<vmem>>, vector<8x1xf32>
    %49 = vector.broadcast %48 : vector<8x1xf32> to vector<8x256xf32>
    %50 = arith.addf %47, %49 : vector<8x256xf32>
    %cst_27 = arith.constant 0.000000e+00 : f32
    %51 = vector.broadcast %cst_27 : f32 to vector<8x256xf32>
    %52 = arith.maximumf %50, %51 : vector<8x256xf32>
    %c0_28 = arith.constant 0 : index
    %c0_29 = arith.constant 0 : index
    %c0_30 = arith.constant 0 : index
    %53 = vector.load %arg5[%c0_28, %c0_29, %c0_30] : memref<1x8x256xf32, #tpu.memory_space<vmem>>, vector<1x8x256xf32>
    %54 = vector.shape_cast %53 : vector<1x8x256xf32> to vector<8x256xf32>
    %55 = vector.shape_cast %52 : vector<8x256xf32> to vector<1x8x256xf32>
    tpu.vector_store %arg5[%c0_28, %c0_29, %c0_30], %55 {strides = array<i32>} : memref<1x8x256xf32, #tpu.memory_space<vmem>>, vector<1x8x256xf32>,
    return
  }
  func.func @transform_0(%arg0: i32) -> (i32, i32, i32) {
    %c0_i32 = arith.constant 0 : i32
    %c0_i32_0 = arith.constant 0 : i32
    %c0_i32_1 = arith.constant 0 : i32
    return %arg0, %c0_i32, %c0_i32_0 : i32, i32, i32
  }
  func.func @transform_1(%arg0: i32) -> (i32, i32) {
    %c0_i32 = arith.constant 0 : i32
    %c0_i32_0 = arith.constant 0 : i32
    %c0_i32_1 = arith.constant 0 : i32
    return %c0_i32, %c0_i32_0 : i32, i32
  }
  func.func @transform_2(%arg0: i32) -> (i32, i32) {
    %c0_i32 = arith.constant 0 : i32
    %c0_i32_0 = arith.constant 0 : i32
    %c0_i32_1 = arith.constant 0 : i32
    return %c0_i32, %c0_i32_0 : i32, i32
  }
  func.func @transform_3(%arg0: i32) -> (i32, i32) {
    %c0_i32 = arith.constant 0 : i32
    %c0_i32_0 = arith.constant 0 : i32
    %c0_i32_1 = arith.constant 0 : i32
    return %c0_i32, %c0_i32_0 : i32, i32
  }
  func.func @transform_4(%arg0: i32) -> (i32, i32, i32) {
    %c0_i32 = arith.constant 0 : i32
    %c0_i32_0 = arith.constant 0 : i32
    %c0_i32_1 = arith.constant 0 : i32
    return %arg0, %c0_i32, %c0_i32_0 : i32, i32, i32
  }
}

</mosaic_0001>

<bundles_post_ra>
// kernel: tpu_custom_call.1
= control target key start
LH: loop header
LB: loop body
LE: loop exit
PB: predicated region body
PF: predicated region fallthrough
CT: control target
= control target key end

     0   :  { %9 = vsyncpa [#allocation4], 0  ;;  %s1316_s0 = inlined_call_operand.hbm [shape: f32[2,4,256], index: 0, kind: input, shape index: {}]   ;;  %s1317_s1 = inlined_call_operand.vmem [shape: bf16[8,144], index: 1, kind: input, shape index: {}]   ;;  %s1318_s2 = inlined_call_operand.vmem [shape: f32[8,1], index: 2, kind: input, shape index: {}]   ;;  %s1319_s3 = inlined_call_operand.vmem [shape: s32[1,256], index: 3, kind: input, shape index: {}]   ;;  %s1320_s4 = inlined_call_operand.hbm [shape: f32[2,8,256], index: 4, kind: output, shape index: {}]  }
   0x1   :  { %11 = vsyncpa [#allocation4 + $0x1], 0 }
   0x2   :  { %12 = vsyncpa [#allocation5], 0 }
   0x3   :  { %14 = vsyncpa [#allocation5 + $0x1], 0  ;;  %s1012_s15 = smov 0   ;;  %s1014_s16 = smov 0  }
   0x4   :  { %s1016_s17 = smov 0   ;;  %s1018_s18 = smov 0  }
   0x5 LB: > { %s1033_s19 = sadd.s32 4294967295, %s969_s18   ;;  %s759_s20 = sadd.s32 4294967294, %s969_s18   ;;  %s969_s18 = sphi %s1018_s18, %s1341_s18   ;;  %s965_s17 = sphi %s1016_s17, %s1340_s17   ;;  %s961_s16 = sphi %s1014_s16, %s1339_s16   ;;  %s957_s15 = sphi %s1012_s15, %s1338_s15  }
   0x6   : > { %s1037_s21 = sadd.s32 1, %s969_s18   ;;  %s27_s22 = sadd.s32 1, %s965_s17 }
   0x7   : > { %s24_s23 = ssub.s32 %s969_s18, %s1037_s21  ;;  %p34_p0 = scmp.ne.s32.totalorder %s965_s17, %s961_s16 }
   0x8   : > { %p25_p1 = scmp.eq.s32.totalorder %s24_s23, 0  ;;  %p35_p2 = scmp.eq.s32.totalorder %s969_s18, 0 }
   0x9   : > { %p40_p3 = scmp.ne.s32.totalorder %s961_s16, %s957_s15  ;;  %p41_p4 = scmp.eq.s32.totalorder %s1033_s19, 0 }
   0xa   : > { %s1049_s24 = scalar_select %p25_p1, %s965_s17, %s27_s22  }
   0xb   : > { %p1051_p5 = por %p35_p2, %p34_p0  ;;  %p1055_p6 = por %p41_p4, %p40_p3 }
   0xc   : > { %p127_p7 = scmp.eq.s32.totalorder %s1033_s19, 1  ;;  %p133_p8 = scmp.eq.s32.totalorder %s759_s20, 1 }
   0xd   : > { %s1324_s26 = scalar_select %p1055_p6, 1, 0 }
   0xe   : > { %p819_p10 = scmp.lt.s32.totalorder %s969_s18, 2  ;;  %p1062_p11 = por %p127_p7, %p34_p0 }
   0xf   : > { %p1066_p12 = por %p133_p8, %p40_p3  ;;  %s162_s29 = sand.u32 1, %s965_s17  }
  0x10   : > { %s1325_s27 = scalar_select %p1062_p11, 1, 0 }
  0x11   : > { %s1326_s28 = scalar_select %p1066_p12, 1, 0 }
  0x12   : > { %s804_s30 = sshll.u32 %s969_s18, 7  ;;  %s762_s5 = sshll.u32 %s162_s29, 3 }
  0x13   : > { %s1075_s8 = scalar_lea.hbm %s1316_s0, %s804_s30  ;;  %s166_s9 = scalar_lea.vmem [#allocation3], %s762_s5 }
  0x14   : > { %s174_s10 = sshll.u32 %s166_s9, 4  ;;  %p1079_p13 = pnand %p819_p10, %p1051_p5  ;;  %s1083_s10 = int_to_ptr.vmem [resolvable:$true] %s174_s10 }
  0x15   : > { %s163_s12 = scalar_lea.sflag [#allocation4], %s162_s29  ;;  %s877_s13 = scalar_lea.hbm %s1075_s8, 128 }
  0x16   : > { %p878_p2 = scmp.ne.s32.totalorder %s1075_s8, %s877_s13  ;;  %p879_p3 = pneg %p1079_p13 }
  0x17   : > { %s882_s22 = scalar_lea.hbm %s1316_s0, 256  ;;  %p883_p5 = scmp.lt.s32.totalorder %s1075_s8, %s1316_s0 }
  0x18   : > { %p880_p4 = pnand %p879_p3, %p878_p2  ;;  %p884_p8 = scmp.lt.s32.totalorder %s882_s22, %s877_s13 }
  0x1a   : > { %p881_p7 = pneg %p880_p4  ;;  %p885_p10 = por %p884_p8, %p883_p5 }
  0x1c   : > { %p886_p9 = pnand %p885_p10, %p881_p7 }
  0x1e   : > { %889 = shalt.err (!%p886_p9)
}
  0x1f   : > { %s890_s29 = scalar_lea.vmem %s1083_s10, 128  ;;  %s971_s30 = smov [#allocation3]  }
  0x20   : > { %p891_p0 = scmp.ne.s32.totalorder %s1083_s10, %s890_s29  ;;  %s895_s5 = sshll.u32 %s971_s30, 4  ;;  %s896_s5 = int_to_ptr.vmem [resolvable:$false] %s895_s5 }
  0x21   : > { %s897_s6 = scalar_lea.vmem %s896_s5, 256  ;;  %p898_p4 = scmp.lt.s32.totalorder %s1083_s10, %s896_s5 }
  0x22   : > { %p893_p1 = pnand %p891_p0, %p879_p3  ;;  %p899_p12 = scmp.lt.s32.totalorder %s897_s6, %s890_s29 }
  0x24   : > { %p894_p2 = pneg %p893_p1  ;;  %p900_p11 = por %p899_p12, %p898_p4 }
  0x26   : > { %p901_p6 = pnand %p900_p11, %p894_p2 }
  0x28   : > { %904 = shalt.err (!%p901_p6)
}
  0x29   : > { %814 = dma.hbm_to_vmem [thread:$0]  (!%p1079_p13), %s1075_s8, 128, %s1083_s10, %s163_s12  }
  0x2a   : > { %p1328_p9 = scmp.lt.s32.totalorder %s969_s18, 3  ;;  %p1329_p7 = scmp.ge.s32.totalorder %s969_s18, 1 }
  0x2c   : > { %p180_p0 = pnand %p1329_p7, %p1328_p9 }
  0x2d   : > { %s1110_s7 = sand.u32 (!%p180_p0), 1, %s961_s16   ;;  %p1330_p6 = scmp.ne.s32.totalorder (!%p180_p0), %s1324_s26, 0 }
  0x2e   : > { %183 = sbr.rel (%p180_p0) target bundleno = 693 (0x2b5), region = 36  ;;  %s766_s9 = sshll.u32 (!%p180_p0), %s1110_s7, 3 }
  0x2f   : > { %s186_s13 = scalar_lea.sflag (!%p180_p0), [#allocation4], %s1110_s7  ;;  %s189_s14 = scalar_lea.vmem (!%p180_p0), [#allocation3], %s766_s9 }
  0x33   : > { %948 = dma.done.wait (%p1330_p6), %s186_s13, 128  }
  0x34   : > { %950 = vsyncadd (%p1330_p6), %s186_s13, 4294967168  ;;  %s767_s8 = sshll.u32 %s1110_s7, 4  ;;  %p768_p11 = scmp.ne.s32.totalorder %s1033_s19, 0 }
  0x35   : > { %s1119_s10 = scalar_lea.vmem [#allocation6], %s767_s8 }
  0x36   : > { %220 = sbr.rel (%p768_p11) target bundleno = 62 (0x3e), region = 44 }
  0x3b   : > { %v972_v0 = vmov 0  }
  0x3c   : > { %221 = vst [vmem:[#allocation2] sm:$0xff] %v972_v0  ;;  %222 = vst [vmem:[#allocation2 + $0x8] sm:$0xff] %v972_v0 }
  0x3d   : > { %223 = vst [vmem:[#allocation2 + $0x10] sm:$0xff] %v972_v0  ;;  %224 = vst [vmem:[#allocation2 + $0x18] sm:$0xff] %v972_v0 }
  0x3e PF: > { %v238_v1 = vld [vmem:[%s1319_s3] sm:$0x3]  ;;  %v246_v2 = vlaneseq  ;;  %v973_v5 = vmov 0   ;;  %s974_s26 = smov 15   ;;  %s975_s20 = smov 127   ;;  %vm324_vm8 = vcmask 121856  }
  0x3f   : > { %v225_v3 = vld [vmem:[%s189_s14] sm:$0xff]  ;;  %vm239_vm0 = vcmp.gt.s32.totalorder %v238_v1, 0  ;;  %vm240_vm1 = vcmp.lt.s32.totalorder %v238_v1, 15  ;;  %867 = vset.pattern.permute.xlu0 %v973_v5  ;;  %s976_s22 = smov 1   ;;  %s977_s23 = smov 113   ;;  %vm313_vm11 = vcmask 7168  }
  0x40   : > { %v227_v4 = vcombine.high %v225_v3, %v225_v3  ;;  %v247_v6 = vshrl.u32 %v246_v2, 7  ;;  %v245_v7 = vsel %vm239_vm0, 1, %v973_v5  ;;  %v269_v8 = vsel %vm240_vm1, 1, %v973_v5  ;;  %s978_s25 = smov 17   ;;  %s979_s29 = smov 95  }
  0x41   : > { %s980_s30 = smov 111   ;;  %s981_s5 = smov 96   ;;  %vm296_vm14 = vcmask 1039360  }
  0x42   : > { %v805_v9 = vpack.c.bf16 %v227_v4, %v225_v3  ;;  %v248_v10 = vsub.s32 0, %v247_v6  ;;  %v252_v11 = vsub.s32 1, %v247_v6  ;;  %s982_s6 = smov 110   ;;  %s983_s9 = smov 126  }
  0x43   : > { %v1130_v18 = vld [vmem:[#allocation2 + $0xc] sm:$0xf]  ;;  %s984_s13 = smov 112   ;;  %s985_s14 = smov 94  }
  0x44   : > { %237 = vst [vmem:[#allocation2 + $0x4] sm:$0x33] %v805_v9  ;;  %v249_v12 = vrot.slane %v245_v7, %v248_v10  ;;  %v253_v13 = vrot.slane %v245_v7, %v252_v11  ;;  %v273_v14 = vrot.slane %v269_v8, %v248_v10  ;;  %v277_v15 = vrot.slane %v269_v8, %v252_v11  ;;  %v1132_v19 = vld [vmem:[#allocation2 + $0x1c] sm:$0xf]  ;;  %v1138_v22 = vld [vmem:[#allocation2 + $0x14] sm:$0xff]  ;;  %p1335_p13 = scmp.ne.s32.totalorder %s1325_s27, 0 }
  0x45   : > { %v792_v20 = vcombine.low %v1130_v18, %v1132_v19  ;;  %v1159_v42 = vld [vmem:[#allocation2 + $0x18] sm:$0xf]  ;;  %v1170_v54 = vld [vmem:[#allocation2 + $0x10] sm:$0xff] }
  0x46   : > { %vm254_vm2 = vcmp.eq.s32.totalorder %v249_v12, 1  ;;  %vm255_vm3 = vcmp.eq.s32.totalorder %v253_v13, 1  ;;  %vm278_vm4 = vcmp.eq.s32.totalorder %v273_v14, 1  ;;  %vm279_vm5 = vcmp.eq.s32.totalorder %v277_v15, 1 }
  0x47   : > { %vm256_vm6 = vmpackc.low %vm255_vm3, %vm254_vm2  ;;  %vm285_vm2 = vcmask 924672  }
  0x48   : > { %v1125_v16 = vsel %vm256_vm6, 65537, %v973_v5  ;;  %vm280_vm7 = vmpackc.low %vm279_vm5, %vm278_vm4  ;;  %vm335_vm4 = vcmask 138240  }
  0x49   : > { %321 = vrot.lane.b32.xlu0 %v1125_v16, %s974_s26  ;;  %293 = vrot.lane.b32.xlu1 %v1125_v16, %s975_s20  ;;  %v281_v17 = vsel %vm280_vm7, 65537, %v973_v5  ;;  %vm497_vm7 = vcmask 777216  }
  0x4b   : > { %v1136_v21 = vld [vmem:[#allocation2 + $0x4] sm:$0xff] }
  0x4c   : > { %v791_v23 = vcombine.high %v1136_v21, %v1138_v22  ;;  %v790_v24 = vcombine.low %v1136_v21, %v1138_v22  ;;  %v1155_v39 = vld [vmem:[#allocation2 + $0x8] sm:$0xf]  ;;  %v1172_v55 = vld [vmem:[#allocation2] sm:$0xff] }
  0x4d   : > { %310 = vrot.lane.b32.xlu0 %v281_v17, %s976_s22  ;;  %282 = vrot.lane.b32.xlu1 %v281_v17, %s977_s23  ;;  %v774_v3 = vcombine.high %v1172_v55, %v1170_v54  ;;  %v775_v9 = vcombine.low %v1155_v39, %v1159_v42  ;;  %v773_v14 = vcombine.low %v1172_v55, %v1170_v54  ;;  %s689_s22 = sshll.u32 %s1119_s10, 4  ;;  %s690_s22 = int_to_ptr.vmem [resolvable:$true] %s689_s22 }
  0x51   : > { %332 = vrot.lane.b32.xlu0 %v281_v17, %s978_s25  ;;  %495 = vrot.lane.b32.xlu1 %v792_v20, %s979_s29 }
  0x55   : > { %493 = vrot.lane.b32.xlu0 %v791_v23, %s979_s29  ;;  %491 = vrot.lane.b32.xlu1 %v790_v24, %s979_s29 }
  0x59   : > { %431 = vrot.lane.b32.xlu1 %v791_v23, %s980_s30  ;;  %429 = vrot.lane.b32.xlu0 %v790_v24, %s980_s30 }
  0xbb   : > { %v322_v25 = vpop.permute.xlu0 %321  ;;  %v294_v26 = vpop.permute.xlu1 %293 }
  0xbc   : > { %v323_v27 = vrot.slane %v322_v25, 4  ;;  %v295_v43 = vrot.slane %v294_v26, 4 }
  0xbe   : > { %v325_v28 = vsel %vm324_vm8, %v323_v27, %v322_v25  ;;  %vm327_vm9 = vcmp.ne.s16.totalorder %v323_v27, 0  ;;  %v297_v50 = vsel %vm296_vm14, %v295_v43, %v294_v26  ;;  %vm299_vm1 = vcmp.ne.s16.totalorder %v295_v43, 0 }
  0xbf   : > { %v329_v29 = vsel %vm327_vm9, %v1130_v18, 0  ;;  %v331_v30 = vsel %vm327_vm9, %v1132_v19, 0  ;;  %v311_v31 = vpop.permute.xlu0 %310  ;;  %v283_v32 = vpop.permute.xlu1 %282  ;;  %vm326_vm10 = vcmp.ne.s16.totalorder %v325_v28, 0  ;;  %vm298_vm0 = vcmp.ne.s16.totalorder %v297_v50, 0 }
  0xc0   : > { %v312_v33 = vrot.slane %v311_v31, 4  ;;  %v284_v34 = vrot.slane %v283_v32, 4  ;;  %v789_v35 = vcombine.low %v329_v29, %v331_v30  ;;  %v328_v36 = vsel %vm326_vm10, %v1136_v21, 0 }
  0xc1   : > { %v330_v37 = vsel %vm326_vm10, %v1138_v22, 0  ;;  %v300_v58 = vsel %vm298_vm0, %v1172_v55, 0  ;;  %v301_v59 = vsel %vm299_vm1, %v1155_v39, 0  ;;  %v302_v60 = vsel %vm298_vm0, %v1170_v54, 0 }
  0xc2   : > { %vm316_vm12 = vcmp.ne.s16.totalorder %v312_v33, 0  ;;  %vm1151_vm13 = vcmp.ne.s16.totalorder %v284_v34, 0  ;;  %473 = vrot.lane.b32.xlu0 %v789_v35, %s981_s5  ;;  %v314_v44 = vsel %vm313_vm11, %v312_v33, %v311_v31  ;;  %v787_v48 = vcombine.low %v328_v36, %v330_v37 }
  0xc3   : > { %v318_v40 = vsel %vm316_vm12, %v1130_v18, 0  ;;  %v320_v41 = vsel %vm316_vm12, %v1132_v19, 0  ;;  %v290_v45 = vsel %vm1151_vm13, %v1155_v39, 0  ;;  %v292_v46 = vsel %vm1151_vm13, %v1159_v42, 0  ;;  %v333_v62 = vpop.permute.xlu0 %332  ;;  %v496_v13 = vpop.permute.xlu1 %495 }
  0xc4   : > { %v786_v47 = vcombine.low %v318_v40, %v320_v41  ;;  %vm315_vm15 = vcmp.ne.s16.totalorder %v314_v44, 0  ;;  %v778_v49 = vcombine.low %v290_v45, %v292_v46  ;;  %v788_v51 = vcombine.high %v328_v36, %v330_v37 }
  0xc5   : > { %v317_v52 = vsel %vm315_vm15, %v1136_v21, 0  ;;  %v319_v53 = vsel %vm315_vm15, %v1138_v22, 0  ;;  %v303_v61 = vsel %vm299_vm1, %v1159_v42, 0  ;;  %v286_v63 = vsel %vm285_vm2, %v284_v34, %v283_v32 }
  0xc6   : > { %451 = vrot.lane.b32.xlu1 %v786_v47, %s982_s6  ;;  %469 = vrot.lane.b32.xlu0 %v787_v48, %s981_s5  ;;  %v784_v56 = vcombine.low %v317_v52, %v319_v53  ;;  %v785_v57 = vcombine.high %v317_v52, %v319_v53  ;;  %v781_v0 = vcombine.low %v301_v59, %v303_v61  ;;  %v334_v2 = vrot.slane %v333_v62, 4 }
  0xc7   : > { %v780_v1 = vcombine.high %v300_v58, %v302_v60  ;;  %vm287_vm3 = vcmp.ne.s16.totalorder %v286_v63, 0  ;;  %v779_v4 = vcombine.low %v300_v58, %v302_v60  ;;  %v492_v23 = vpop.permute.xlu1 %491  ;;  %vm261_vm8 = vcmask 908288  }
  0xc8   : > { %v289_v5 = vsel %vm287_vm3, %v1172_v55, 0  ;;  %v291_v6 = vsel %vm287_vm3, %v1170_v54, 0  ;;  %v336_v7 = vsel %vm335_vm4, %v334_v2, %v333_v62  ;;  %vm338_vm6 = vcmp.ne.s16.totalorder %v334_v2, 0 }
  0xc9   : > { %v777_v8 = vcombine.high %v289_v5, %v291_v6  ;;  %vm337_vm5 = vcmp.ne.s16.totalorder %v336_v7, 0  ;;  %v776_v12 = vcombine.low %v289_v5, %v291_v6  ;;  %v342_v17 = vsel %vm338_vm6, %v1132_v19, 0 }
  0xca   : > { %471 = vrot.lane.b32.xlu1 %v788_v51, %s981_s5  ;;  %394 = vrot.lane.b32.xlu0 %v778_v49, %s983_s9  ;;  %v339_v10 = vsel %vm337_vm5, %v1136_v21, 0  ;;  %v341_v11 = vsel %vm337_vm5, %v1138_v22, 0  ;;  %v494_v22 = vpop.permute.xlu0 %493  ;;  %vm475_vm9 = vcmask 785408   ;;  %vm453_vm10 = vcmask 900096   ;;  %s905_s5 = scalar_lea.vmem %s690_s22, 256 }
  0xcb   : > { %v793_v15 = vcombine.low %v339_v10, %v341_v11  ;;  %v794_v21 = vcombine.high %v339_v10, %v341_v11  ;;  %v499_v24 = vsel %vm497_vm7, %v494_v22, %v496_v13  ;;  %v498_v25 = vsel %vm497_vm7, %v492_v23, %v494_v22  ;;  %v432_v26 = vpop.permute.xlu1 %431  ;;  %v523_v11 = vld [vmem:[%s1318_s2] sm:$0xff]  ;;  %p906_p12 = scmp.ne.s32.totalorder %s690_s22, %s905_s5 }
  0xcc   : > { %vm418_vm11 = vcmask 916480   ;;  %vm396_vm12 = vcmask 1031168   ;;  %vm625_vm0 = vcmask 130048  }
  0xcd   : > { %p907_p1 = pnand %p906_p12, %p1335_p13 }
  0xce   : > { %447 = vrot.lane.b32.xlu1 %v784_v56, %s982_s6  ;;  %449 = vrot.lane.b32.xlu0 %v785_v57, %s982_s6  ;;  %v430_v27 = vpop.permute.xlu0 %429 }
  0xcf   : > { %p908_p3 = pneg %p907_p1 }
  0xd2   : > { %416 = vrot.lane.b32.xlu1 %v781_v0, %s984_s13  ;;  %414 = vrot.lane.b32.xlu0 %v780_v1, %s984_s13 }
  0xd6   : > { %371 = vrot.lane.b32.xlu1 %v774_v3, %s975_s20  ;;  %412 = vrot.lane.b32.xlu0 %v779_v4, %s984_s13 }
  0xda   : > { %258 = vrot.lane.b32.xlu0 %v1125_v16, %s980_s30  ;;  %392 = vrot.lane.b32.xlu1 %v777_v8, %s983_s9  ;;  %v340_v16 = vsel %vm338_vm6, %v1130_v18, 0  ;;  %v433_v18 = vsel %vm261_vm8, %v430_v27, %v432_v26  ;;  %s675_s30 = scalar_lea.sflag [#allocation5], %s1110_s7 }
  0xdb   : > { %v795_v20 = vcombine.low %v340_v16, %v342_v17 }
  0xde   : > { %373 = vrot.lane.b32.xlu0 %v775_v9, %s975_s20  ;;  %390 = vrot.lane.b32.xlu1 %v776_v12, %s983_s9 }
  0xe2   : > { %369 = vrot.lane.b32.xlu1 %v773_v14, %s975_s20  ;;  %513 = vrot.lane.b32.xlu0 %v793_v15, %s985_s14  ;;  %s806_s20 = sshll.u32 %s1033_s19, 8  ;;  %s986_s19 = smov [#allocation6]  }
  0xe3   : > { %s1278_s29 = scalar_lea.hbm %s1320_s4, %s806_s20  ;;  %s909_s6 = sshll.u32 %s986_s19, 4  ;;  %s910_s6 = int_to_ptr.vmem [resolvable:$false] %s909_s6 }
  0xe4   : > { %s911_s9 = scalar_lea.vmem %s910_s6, 512  ;;  %p912_p5 = scmp.lt.s32.totalorder %s690_s22, %s910_s6 }
  0xe5   : > { %p913_p8 = scmp.lt.s32.totalorder %s911_s9, %s905_s5 }
  0xe6   : > { %517 = vrot.lane.b32.xlu0 %v795_v20, %s985_s14  ;;  %515 = vrot.lane.b32.xlu1 %v794_v21, %s985_s14 }
  0xe7   : > { %p914_p10 = por %p913_p8, %p912_p5 }
  0xe9   : > { %p915_p2 = pnand %p914_p10, %p908_p3 }
  0xea   : > { %581 = vrot.lane.b32.xlu0 %v499_v24, %s978_s25  ;;  %579 = vrot.lane.b32.xlu1 %v498_v25, %s978_s25 }
  0xee   : > { %561 = vrot.lane.b32.xlu0 %v433_v18, %s978_s25  ;;  %577 = vrot.lane.b32.xlu1 %v492_v23, %s978_s25 }
  0xf2   : > { %559 = vrot.lane.b32.xlu0 %v430_v27, %s978_s25  ;;  %563 = vrot.lane.b32.xlu1 %v432_v26, %s978_s25 }
 0x134   : > { %v474_v19 = vpop.permute.xlu0 %473 }
 0x138   : > { %v452_v28 = vpop.permute.xlu1 %451  ;;  %v470_v29 = vpop.permute.xlu0 %469 }
 0x13c   : > { %v472_v30 = vpop.permute.xlu1 %471  ;;  %v395_v31 = vpop.permute.xlu0 %394 }
 0x13d   : > { %551 = vrot.lane.b32.xlu1 %v395_v31, %s978_s25  ;;  %v477_v36 = vsel %vm475_vm9, %v472_v30, %v474_v19  ;;  %v476_v44 = vsel %vm475_vm9, %v470_v29, %v472_v30 }
 0x140   : > { %v448_v32 = vpop.permute.xlu1 %447  ;;  %v450_v33 = vpop.permute.xlu0 %449 }
 0x141   : > { %565 = vrot.lane.b32.xlu1 %v448_v32, %s978_s25  ;;  %v454_v40 = vsel %vm453_vm10, %v448_v32, %v450_v33  ;;  %v455_v47 = vsel %vm453_vm10, %v450_v33, %v452_v28 }
 0x144   : > { %v417_v34 = vpop.permute.xlu1 %416  ;;  %v415_v35 = vpop.permute.xlu0 %414 }
 0x145   : > { %557 = vrot.lane.b32.xlu0 %v417_v34, %s978_s25  ;;  %575 = vrot.lane.b32.xlu1 %v477_v36, %s978_s25  ;;  %v420_v52 = vsel %vm418_vm11, %v415_v35, %v417_v34 }
 0x148   : > { %v372_v37 = vpop.permute.xlu1 %371  ;;  %v413_v38 = vpop.permute.xlu0 %412 }
 0x149   : > { %571 = vrot.lane.b32.xlu0 %v470_v29, %s978_s25  ;;  %567 = vrot.lane.b32.xlu1 %v454_v40, %s978_s25  ;;  %v419_v59 = vsel %vm418_vm11, %v413_v38, %v415_v35 }
 0x14c   : > { %v259_v41 = vpop.permute.xlu0 %258  ;;  %v393_v43 = vpop.permute.xlu1 %392 }
 0x14d   : > { %573 = vrot.lane.b32.xlu0 %v476_v44, %s978_s25  ;;  %v260_v49 = vrot.slane %v259_v41, 4  ;;  %v398_v56 = vsel %vm396_vm12, %v393_v43, %v395_v31 }
 0x14f   : > { %v262_v53 = vsel %vm261_vm8, %v260_v49, %v259_v41  ;;  %vm1220_vm15 = vcmp.ne.s16.totalorder %v260_v49, 0 }
 0x150   : > { %v374_v45 = vpop.permute.xlu0 %373  ;;  %v391_v46 = vpop.permute.xlu1 %390  ;;  %vm263_vm13 = vcmp.ne.s16.totalorder %v262_v53, 0  ;;  %v266_v2 = vsel %vm1220_vm15, %v1155_v39, 0  ;;  %v268_v3 = vsel %vm1220_vm15, %v1159_v42, 0 }
 0x151   : > { %569 = vrot.lane.b32.xlu0 %v455_v47, %s978_s25  ;;  %v376_v48 = vsel %vm296_vm14, %v372_v37, %v374_v45  ;;  %v265_v61 = vsel %vm263_vm13, %v1172_v55, 0  ;;  %v267_v62 = vsel %vm263_vm13, %v1170_v54, 0  ;;  %v397_v63 = vsel %vm396_vm12, %v391_v46, %v393_v43  ;;  %v1240_v54 = vld [vmem:[%s1317_s1] sm:$0xff] }
 0x152   : > { %543 = vrot.lane.b32.xlu1 %v376_v48, %s978_s25  ;;  %v771_v39 = vcombine.high %v265_v61, %v267_v62  ;;  %v797_v55 = vcombine.high %v1240_v54, %v1240_v54  ;;  %v772_v42 = vcombine.low %v266_v2, %v268_v3  ;;  %v770_v8 = vcombine.low %v265_v61, %v267_v62 }
 0x154   : > { %v370_v50 = vpop.permute.xlu1 %369  ;;  %v514_v51 = vpop.permute.xlu0 %513  ;;  %798 = vmatprep.mubr.msk.bf16.mxu0 %vm625_vm0, %v797_v55 }
 0x155   : > { %545 = vrot.lane.b32.xlu0 %v374_v45, %s978_s25  ;;  %v375_v4 = vsel %vm296_vm14, %v370_v50, %v372_v37  ;;  %vm519_vm14 = vcmask 769024  }
 0x156   : > { %555 = vrot.lane.b32.xlu1 %v420_v52, %s978_s25 }
 0x158   : > { %v518_v57 = vpop.permute.xlu0 %517  ;;  %v516_v58 = vpop.permute.xlu1 %515 }
 0x159   : > { %549 = vrot.lane.b32.xlu0 %v398_v56, %s978_s25  ;;  %v520_v9 = vsel %vm519_vm14, %v514_v51, %v516_v58  ;;  %v521_v10 = vsel %vm519_vm14, %v516_v58, %v518_v57  ;;  %v796_v56 = vcombine.low %v1240_v54, %v1240_v54 }
 0x15a   : > { %553 = vrot.lane.b32.xlu1 %v419_v59, %s978_s25 }
 0x15c   : > { %v582_v0 = vpop.permute.xlu0 %581  ;;  %v580_v1 = vpop.permute.xlu1 %579 }
 0x15d   : > { %547 = vrot.lane.b32.xlu0 %v397_v63, %s978_s25  ;;  %v604_v5 = vsel %vm335_vm4, %v580_v1, %v582_v0 }
 0x15e   : > { %541 = vrot.lane.b32.xlu1 %v375_v4, %s978_s25  ;;  %629 = vmatprep.subr.bf16.mxu0 %v604_v5 }
 0x160   : > { %v578_v6 = vpop.permute.xlu1 %577  ;;  %v562_v13 = vpop.permute.xlu0 %561 }
 0x161   : > { %537 = vrot.lane.b32.xlu0 %v771_v39, %s978_s25  ;;  %v603_v7 = vsel %vm335_vm4, %v578_v6, %v580_v1 }
 0x162   : > { %539 = vrot.lane.b32.xlu1 %v772_v42, %s978_s25  ;;  %630 = vmatpush1.bf16.msra.mxu0 %v603_v7 }
 0x164   : > { %v564_v12 = vpop.permute.xlu1 %563  ;;  %v560_v15 = vpop.permute.xlu0 %559 }
 0x165   : > { %535 = vrot.lane.b32.xlu0 %v770_v8, %s978_s25  ;;  %v598_v28 = vsel %vm335_vm4, %v562_v13, %v564_v12  ;;  %v597_v31 = vsel %vm335_vm4, %v560_v15, %v562_v13 }
 0x166   : > { %585 = vrot.lane.b32.xlu1 %v520_v9, %s978_s25 }
 0x169   : > { %587 = vrot.lane.b32.xlu0 %v521_v10, %s978_s25 }
 0x16a   : > { %583 = vrot.lane.b32.xlu1 %v514_v51, %s978_s25 }
 0x16d   : > { %526 = vperm.xlu0 %867, %v523_v11  }
 0x1af   : > { %v552_v14 = vpop.permute.xlu1 %551 }
 0x1b3   : > { %v566_v16 = vpop.permute.xlu1 %565 }
 0x1b7   : > { %v558_v17 = vpop.permute.xlu0 %557  ;;  %v576_v20 = vpop.permute.xlu1 %575 }
 0x1bb   : > { %v572_v21 = vpop.permute.xlu0 %571  ;;  %v568_v23 = vpop.permute.xlu1 %567 }
 0x1bc   : > { %v599_v19 = vsel %vm335_vm4, %v566_v16, %v568_v23 }
 0x1bf   : > { %v574_v22 = vpop.permute.xlu0 %573 }
 0x1c0   : > { %v602_v24 = vsel %vm335_vm4, %v574_v22, %v576_v20  ;;  %v601_v25 = vsel %vm335_vm4, %v572_v21, %v574_v22 }
 0x1c1   : > { %631 = vmatprep.subr.bf16.mxu0 %v602_v24 }
 0x1c2   : > { %632 = vmatpush1.bf16.msra.mxu0 %v601_v25 }
 0x1c3   : > { %v570_v26 = vpop.permute.xlu0 %569 }
 0x1c4   : > { %v544_v27 = vpop.permute.xlu1 %543  ;;  %v600_v18 = vsel %vm335_vm4, %v568_v23, %v570_v26 }
 0x1c5   : > { %633 = vmatprep.subr.bf16.mxu0 %v600_v18 }
 0x1c6   : > { %634 = vmatpush1.bf16.msra.mxu0 %v599_v19 }
 0x1c7   : > { %v546_v29 = vpop.permute.xlu0 %545  ;;  %635 = vmatprep.subr.bf16.mxu0 %v598_v28 }
 0x1c8   : > { %v556_v30 = vpop.permute.xlu1 %555  ;;  %v592_v41 = vsel %vm335_vm4, %v544_v27, %v546_v29 }
 0x1c9   : > { %v596_v32 = vsel %vm335_vm4, %v556_v30, %v558_v17 }
 0x1ca   : > { %636 = vmatpush1.bf16.msra.mxu0 %v597_v31 }
 0x1cb   : > { %v550_v33 = vpop.permute.xlu0 %549  ;;  %637 = vmatprep.subr.bf16.mxu0 %v596_v32 }
 0x1cc   : > { %v554_v34 = vpop.permute.xlu1 %553  ;;  %v594_v36 = vsel %vm335_vm4, %v550_v33, %v552_v14 }
 0x1cd   : > { %v595_v35 = vsel %vm335_vm4, %v554_v34, %v556_v30 }
 0x1ce   : > { %638 = vmatpush1.bf16.msra.mxu0 %v595_v35 }
 0x1cf   : > { %v548_v37 = vpop.permute.xlu0 %547  ;;  %639 = vmatprep.subr.bf16.mxu0 %v594_v36 }
 0x1d0   : > { %v542_v38 = vpop.permute.xlu1 %541  ;;  %v593_v40 = vsel %vm335_vm4, %v548_v37, %v550_v33 }
 0x1d1   : > { %v591_v45 = vsel %vm335_vm4, %v542_v38, %v544_v27 }
 0x1d2   : > { %640 = vmatpush1.bf16.msra.mxu0 %v593_v40 }
 0x1d3   : > { %v538_v43 = vpop.permute.xlu0 %537  ;;  %641 = vmatprep.subr.bf16.mxu0 %v592_v41 }
 0x1d4   : > { %v540_v44 = vpop.permute.xlu1 %539 }
 0x1d5   : > { %v590_v46 = vsel %vm335_vm4, %v538_v43, %v540_v44 }
 0x1d6   : > { %642 = vmatpush1.bf16.msra.mxu0 %v591_v45 }
 0x1d7   : > { %v536_v47 = vpop.permute.xlu0 %535  ;;  %643 = vmatprep.subr.bf16.mxu0 %v590_v46 }
 0x1d8   : > { %v586_v48 = vpop.permute.xlu1 %585  ;;  %v589_v49 = vsel %vm335_vm4, %v536_v47, %v538_v43 }
 0x1da   : > { %644 = vmatpush1.bf16.msra.mxu0 %v589_v49 }
 0x1db   : > { %v588_v50 = vpop.permute.xlu0 %587 }
 0x1dc   : > { %v584_v51 = vpop.permute.xlu1 %583  ;;  %v606_v52 = vsel %vm335_vm4, %v586_v48, %v588_v50 }
 0x1dd   : > { %659 = vmatprep.subr.bf16.mxu0 %v606_v52  ;;  %v605_v53 = vsel %vm335_vm4, %v584_v51, %v586_v48 }
 0x1de   : > { %660 = vmatpush2.bf16.msra.mxu0 %v605_v53 }
 0x1e1   : > { %662 = vmatmul.mubr.bf16.vlgmr.msra.gmra.mxu0 %v796_v56 }
 0x1e8   : > { %v527_v57 = vpop.permute.xlu0 %526 }
 0x2a1   : > { %v663_v58 = vpop.f32.mrf.mxu0 }
 0x2a2   : > { %v664_v59 = vadd.f32 %v663_v58, %v527_v57 }
 0x2a3   : > { %v665_v60 = vpop.f32.mrf.mxu0 }
 0x2a4   : > { %v670_v61 = vmax.f32 %v664_v59, 0.0  ;;  %v666_v62 = vadd.f32 %v665_v60, %v527_v57 }
 0x2a5   : > { %v667_v63 = vpop.f32.mrf.mxu0 }
 0x2a6   : > { %672 = vst [vmem:[%s1119_s10] sm:$0xff] %v670_v61  ;;  %v671_v0 = vmax.f32 %v666_v62, 0.0 }
 0x2a7   : > { %v668_v1 = vpop.f32.mrf.mxu0 }
 0x2a8   : > { %673 = vst [vmem:[%s1119_s10 + $0x8] sm:$0xff] %v671_v0 }
 0x2a9   : > { %918 = shalt.err (!%p915_p2)
}
 0x2aa   : > { %s919_s10 = scalar_lea.hbm %s1278_s29, 256  ;;  %s923_s14 = scalar_lea.hbm %s1320_s4, 512 }
 0x2ab   : > { %p920_p4 = scmp.ne.s32.totalorder %s1278_s29, %s919_s10  ;;  %p924_p0 = scmp.lt.s32.totalorder %s1278_s29, %s1320_s4 }
 0x2ac   : > { %p925_p6 = scmp.lt.s32.totalorder %s923_s14, %s919_s10 }
 0x2ad   : > { %p921_p9 = pnand %p920_p4, %p1335_p13 }
 0x2ae   : > { %p926_p11 = por %p925_p6, %p924_p0 }
 0x2af   : > { %p922_p7 = pneg %p921_p9 }
 0x2b1   : > { %p927_p12 = pnand %p926_p11, %p922_p7 }
 0x2b3   : > { %930 = shalt.err (!%p927_p12)
}
 0x2b4   : > { %809 = dma.vmem_to_hbm [thread:$0]  (%p1335_p13), %s690_s22, 256, %s1278_s29, %s675_s30  }
 0x2b5 PF: > { %s701_s12 = sand.u32 1, %s957_s15   ;;  %p1336_p1 = scmp.ne.s32.totalorder %s1326_s28, 0 }
 0x2b6   : > { %p1337_p3 = scmp.ge.s32.totalorder %s969_s18, 2  ;;  %s702_s26 = scalar_lea.sflag [#allocation5], %s701_s12 }
 0x2b8   : > { %p816_p5 = pnand %p1337_p3, %p1336_p1 }
 0x2ba   : > { %p817_p8 = pneg %p816_p5 }
 0x2bc   : > { %952 = dma.done.wait (%p817_p8), %s702_s26, 256  }
 0x2bd   : > { %954 = vsyncadd (%p817_p8), %s702_s26, 4294967040  ;;  %p17_p10 = scmp.ge.s32.totalorder %s1037_s21, 4   ;;  %s1338_s15 = smov %s961_s16 }
 0x2be   : > { %s1339_s16 = smov %s965_s17  ;;  %s1340_s17 = smov %s1049_s24 }
 0x2bf   : > { %s1341_s18 = smov %s1037_s21  ;;  %19 = sbr.rel (!%p17_p10) target bundleno = 5 (0x5), region = 85 }
 0x2c4   :  { %707 = vsyncpa [#allocation4], 1 }
 0x2c5   :  { %709 = vsyncpa [#allocation4 + $0x1], 1 }
 0x2c6   :  { %710 = vsyncpa [#allocation5], 1 }
 0x2c7   :  { %712 = vsyncpa [#allocation5 + $0x1], 1 }

</bundles_post_ra>
